<compile_context>
chip_gen: v7x
topology: tpu7x:2x2x1
jax: 0.10.0
libtpu: 0.0.40
codegen_flags: <defaults>
</compile_context>

<pallas_src>
import jax
import jax.numpy as jnp
from jax import lax
from jax.experimental import pallas as pl
from jax.experimental.pallas import tpu as pltpu


# ---------------------------------------------------------------------------
# Pallas kernel: conv(im2col matmul) + bias + ReLU + running spatial sum,
# finalized with the head matmul (pool scale folded into the head weight).
# ---------------------------------------------------------------------------
def base_head_kernel(p_ref, wc_ref, bc_ref, wh_ref, bh_ref, o_ref, acc_ref):
    # p_ref : (tP, KC)        bf16 im2col patch tile (batch dim squeezed)
    # wc_ref: (KC, Cf_pad)    bf16 conv weight
    # bc_ref: (1, Cf_pad)     f32 conv bias
    # wh_ref: (Cf_pad, K_pad) bf16 head weight, pre-scaled by 1/P
    # bh_ref: (1, K_pad)      f32 head bias
    # o_ref : (1, K_pad)      f32 logits for this batch row
    # acc_ref: (1, Cf_pad)    f32 running spatial sum (pool numerator)
    p_idx = pl.program_id(1)

    @pl.when(p_idx == 0)
    def _init():
        acc_ref[...] = jnp.zeros_like(acc_ref)

    # Conv as a single 2-D MXU matmul with f32 accumulation.
    feat = jnp.dot(p_ref[...], wc_ref[...], preferred_element_type=jnp.float32)
    feat = jnp.maximum(feat + bc_ref[...], 0.0)          # fused bias + ReLU
    # Running sum over the spatial tile (== avg-pool numerator); the 1/P
    # scale lives in wh_ref, so no divide here.
    acc_ref[...] += jnp.sum(feat, axis=0, keepdims=True)

    @pl.when(p_idx == pl.num_programs(1) - 1)
    def _finalize():
        pooled = acc_ref[...].astype(wh_ref.dtype)       # (1, Cf_pad)
        logits = jnp.dot(pooled, wh_ref[...],
                         preferred_element_type=jnp.float32) + bh_ref[...]
        o_ref[...] = logits.astype(o_ref.dtype)


# ---------------------------------------------------------------------------
# Wrapper: im2col glue + padding to MXU/lane friendly shapes + pallas_call
# ---------------------------------------------------------------------------
def _round_up(n, m):
    return (n + m - 1) // m * m


def base_head_net(x, w_conv, b_conv, w_head, b_head):
    """x: (B, Cin, H, W) NCHW float32; returns (B, Kout) float32 logits."""
    B, Cin, H, W = x.shape
    Cf = w_conv.shape[0]
    Kout = w_head.shape[1]
    P = H * W
    KC = 9 * Cin

    LANE = 128
    Cf_pad = _round_up(Cf, LANE)
    Kout_pad = _round_up(Kout, LANE)

    # Spatial tile: multiple of 8 sublanes, divides P (fallback: whole P).
    tP = next((c for c in (128, 64, 32, 16, 8) if P % c == 0), P)
    n_ptiles = P // tP

    # --- glue: pad + im2col (layout transform only, done once by XLA) ---
    xp = jnp.pad(x, ((0, 0), (0, 0), (1, 1), (1, 1)))
    cols = [xp[:, :, dy:dy + H, dx:dx + W] for dy in range(3) for dx in range(3)]
    patches = jnp.stack(cols, axis=1)                       # (B, 9, Cin, H, W)
    patches = patches.transpose(0, 3, 4, 1, 2).reshape(B, P, KC)
    patches = patches.astype(jnp.bfloat16)

    # Conv weight (Cf, Cin, 3, 3) -> (KC, Cf) matching (dy*3+dx)*Cin + cin,
    # zero-padded on the output-channel (lane) dim.
    wc = w_conv.transpose(2, 3, 1, 0).reshape(KC, Cf)
    wc = jnp.pad(wc, ((0, 0), (0, Cf_pad - Cf))).astype(jnp.bfloat16)
    bc = jnp.pad(b_conv, (0, Cf_pad - Cf)).reshape(1, Cf_pad).astype(jnp.float32)

    # Head weight with the 1/P pooling scale folded in; zero-padded on both
    # dims so padded channels / padded logits stay exactly zero.
    wh = jnp.pad(w_head / float(P),
                 ((0, Cf_pad - Cf), (0, Kout_pad - Kout))).astype(jnp.bfloat16)
    bh = jnp.pad(b_head, (0, Kout_pad - Kout)).reshape(1, Kout_pad)
    bh = bh.astype(jnp.float32)

    out = pl.pallas_call(
        base_head_kernel,
        out_shape=jax.ShapeDtypeStruct((B, 1, Kout_pad), jnp.float32),
        grid_spec=pltpu.PrefetchScalarGridSpec(
            num_scalar_prefetch=0,
            grid=(B, n_ptiles),
            in_specs=[
                # streamed patch tile, batch dim squeezed -> kernel sees (tP, KC)
                pl.BlockSpec((None, tP, KC), lambda b, p: (b, p, 0)),
                pl.BlockSpec((KC, Cf_pad), lambda b, p: (0, 0)),
                pl.BlockSpec((1, Cf_pad), lambda b, p: (0, 0)),
                pl.BlockSpec((Cf_pad, Kout_pad), lambda b, p: (0, 0)),
                pl.BlockSpec((1, Kout_pad), lambda b, p: (0, 0)),
            ],
            out_specs=pl.BlockSpec((None, 1, Kout_pad), lambda b, p: (b, 0, 0)),
            scratch_shapes=[pltpu.VMEM((1, Cf_pad), jnp.float32)],
        ),
        compiler_params=pltpu.CompilerParams(
            dimension_semantics=("parallel", "arbitrary"),
            vmem_limit_bytes=32 * 1024 * 1024),
    )(patches, wc, bc, wh, bh)

    return out.reshape(B, Kout_pad)[:, :Kout]


# ---------------------------------------------------------------------------
# Pure-JAX reference (mirrors the PyTorch forward exactly, in f32)
# ---------------------------------------------------------------------------
def reference(x, w_conv, b_conv, w_head, b_head):
    feat = lax.conv_general_dilated(
        x, w_conv, window_strides=(1, 1), padding="SAME",
        dimension_numbers=("NCHW", "OIHW", "NCHW"))
    feat = jnp.maximum(feat + b_conv[None, :, None, None], 0.0)  # base + ReLU
    pooled = jnp.mean(feat, axis=(2, 3))                         # pool+squeeze
    out = pooled @ w_head + b_head[None, :]                      # head
    return jnp.squeeze(out)                                      # final squeeze


if __name__ == "__main__":
    B, Cin, H, W = 2, 4, 16, 16
    Cf, Kout = 32, 10

    key = jax.random.PRNGKey(0)
    kx, kwc, kbc, kwh, kbh = jax.random.split(key, 5)

    x = jax.random.normal(kx, (B, Cin, H, W), jnp.float32)
    w_conv = jax.random.normal(kwc, (Cf, Cin, 3, 3), jnp.float32) * 0.1
    b_conv = jax.random.normal(kbc, (Cf,), jnp.float32) * 0.1
    # nn.Linear stores (out, in); we keep the transposed (in, out) form.
    w_head = jax.random.normal(kwh, (Cf, Kout), jnp.float32) * 0.1
    b_head = jax.random.normal(kbh, (Kout,), jnp.float32) * 0.1

    fn = jax.jit(base_head_net)
    out = jax.block_until_ready(fn(x, w_conv, b_conv, w_head, b_head))

    ref = reference(x, w_conv, b_conv, w_head, b_head)
    assert out.shape == (B, Kout), out.shape
    # bf16 patches/weights (f32 accumulation) => compare at bf16-level tolerance.
    assert jnp.allclose(out, ref, atol=2e-2, rtol=2e-2), (
        float(jnp.max(jnp.abs(out - ref))))

    print("KERNEL_OK")
</pallas_src>

<mosaic_0001>
module attributes {stable_mosaic.version = 11 : i64} {
  func.func @base_head_kernel(%arg0: i32, %arg1: i32, %arg2: memref<1x128x36xbf16, #tpu.memory_space<vmem>>, %arg3: memref<36x128xbf16, #tpu.memory_space<vmem>>, %arg4: memref<1x128xf32, #tpu.memory_space<vmem>>, %arg5: memref<128x128xbf16, #tpu.memory_space<vmem>>, %arg6: memref<1x128xf32, #tpu.memory_space<vmem>>, %arg7: memref<1x1x128xf32, #tpu.memory_space<vmem>>, %arg8: memref<1x128xf32, #tpu.memory_space<vmem>>) attributes {dimension_semantics = [#tpu.dimension_semantics<parallel>, #tpu.dimension_semantics<arbitrary>], iteration_bounds = array<i64: 2, 2>, scalar_prefetch = 0 : i64, scratch_operands = 1 : i64, tpu.core_type = #tpu.core_type<tc>, window_params = [{transform_indices = @transform_0, window_bounds = array<i64: 1, 128, 36>}, {pipeline_mode = #tpu.pipeline_mode<synchronous>, transform_indices = @transform_1, window_bounds = array<i64: 36, 128>}, {pipeline_mode = #tpu.pipeline_mode<synchronous>, transform_indices = @transform_2, window_bounds = array<i64: 1, 128>}, {pipeline_mode = #tpu.pipeline_mode<synchronous>, transform_indices = @transform_3, window_bounds = array<i64: 128, 128>}, {pipeline_mode = #tpu.pipeline_mode<synchronous>, transform_indices = @transform_4, window_bounds = array<i64: 1, 128>}, {transform_indices = @transform_5, window_bounds = array<i64: 1, 1, 128>}]} {
    %c0_i32 = arith.constant 0 : i32
    %0 = arith.cmpi eq, %arg1, %c0_i32 : i32
    %1 = arith.extui %0 : i1 to i32
    %c0_i32_0 = arith.constant 0 : i32
    %2 = arith.cmpi ne, %1, %c0_i32_0 : i32
    scf.if %2 {
      %cst_14 = arith.constant 0.000000e+00 : f32
      %20 = vector.broadcast %cst_14 : f32 to vector<1x128xf32>
      %c0_15 = arith.constant 0 : index
      %c0_16 = arith.constant 0 : index
      %21 = vector.load %arg8[%c0_15, %c0_16] : memref<1x128xf32, #tpu.memory_space<vmem>>, vector<1x128xf32>
      tpu.vector_store %arg8[%c0_15, %c0_16], %20 {strides = array<i32>} : memref<1x128xf32, #tpu.memory_space<vmem>>, vector<1x128xf32>,
    } else {
    }
    %c0 = arith.constant 0 : index
    %c0_1 = arith.constant 0 : index
    %c0_2 = arith.constant 0 : index
    %3 = vector.load %arg2[%c0, %c0_1, %c0_2] : memref<1x128x36xbf16, #tpu.memory_space<vmem>>, vector<1x128x36xbf16>
    %4 = vector.shape_cast %3 : vector<1x128x36xbf16> to vector<128x36xbf16>
    %c0_3 = arith.constant 0 : index
    %c0_4 = arith.constant 0 : index
    %5 = vector.load %arg3[%c0_3, %c0_4] : memref<36x128xbf16, #tpu.memory_space<vmem>>, vector<36x128xbf16>
    %cst = arith.constant dense<0.000000e+00> : vector<128x128xf32>
    %6 = tpu.matmul %4, %5, %cst {dimension_numbers = #tpu.dot_dimension_numbers<[1], [0], [0], [1], [0, 0, 1, 1], [], []>} : vector<128x36xbf16>, vector<36x128xbf16>, vector<128x128xf32> -> vector<128x128xf32>
    %c0_5 = arith.constant 0 : index
    %c0_6 = arith.constant 0 : index
    %7 = vector.load %arg4[%c0_5, %c0_6] : memref<1x128xf32, #tpu.memory_space<vmem>>, vector<1x128xf32>
    %8 = vector.broadcast %7 : vector<1x128xf32> to vector<128x128xf32>
    %9 = arith.addf %6, %8 : vector<128x128xf32>
    %cst_7 = arith.constant 0.000000e+00 : f32
    %10 = vector.broadcast %cst_7 : f32 to vector<128x128xf32>
    %11 = arith.maximumf %9, %10 : vector<128x128xf32>
    %c0_8 = arith.constant 0 : index
    %c0_9 = arith.constant 0 : index
    %12 = vector.load %arg8[%c0_8, %c0_9] : memref<1x128xf32, #tpu.memory_space<vmem>>, vector<1x128xf32>
    %cst_10 = arith.constant dense<0.000000e+00> : vector<128xf32>
    %13 = vector.multi_reduction <add>, %11, %cst_10 [0] : vector<128x128xf32> to vector<128xf32>
    %14 = vector.shape_cast %13 : vector<128xf32> to vector<1x128xf32>
    %15 = arith.addf %12, %14 : vector<1x128xf32>
    %c0_11 = arith.constant 0 : index
    %c0_12 = arith.constant 0 : index
    %16 = vector.load %arg8[%c0_11, %c0_12] : memref<1x128xf32, #tpu.memory_space<vmem>>, vector<1x128xf32>
    tpu.vector_store %arg8[%c0_11, %c0_12], %15 {strides = array<i32>} : memref<1x128xf32, #tpu.memory_space<vmem>>, vector<1x128xf32>,
    %c1_i32 = arith.constant 1 : i32
    %17 = arith.cmpi eq, %arg1, %c1_i32 : i32
    %18 = arith.extui %17 : i1 to i32
    %c0_i32_13 = arith.constant 0 : i32
    %19 = arith.cmpi ne, %18, %c0_i32_13 : i32
    scf.if %19 {
      %c0_14 = arith.constant 0 : index
      %c0_15 = arith.constant 0 : index
      %20 = vector.load %arg8[%c0_14, %c0_15] : memref<1x128xf32, #tpu.memory_space<vmem>>, vector<1x128xf32>
      %21 = arith.truncf %20 : vector<1x128xf32> to vector<1x128xbf16>
      %c0_16 = arith.constant 0 : index
      %c0_17 = arith.constant 0 : index
      %22 = vector.load %arg5[%c0_16, %c0_17] : memref<128x128xbf16, #tpu.memory_space<vmem>>, vector<128x128xbf16>
      %cst_18 = arith.constant dense<0.000000e+00> : vector<1x128xf32>
      %23 = tpu.matmul %21, %22, %cst_18 {dimension_numbers = #tpu.dot_dimension_numbers<[1], [0], [0], [1], [0, 0, 1, 1], [], []>} : vector<1x128xbf16>, vector<128x128xbf16>, vector<1x128xf32> -> vector<1x128xf32>
      %c0_19 = arith.constant 0 : index
      %c0_20 = arith.constant 0 : index
      %24 = vector.load %arg6[%c0_19, %c0_20] : memref<1x128xf32, #tpu.memory_space<vmem>>, vector<1x128xf32>
      %25 = arith.addf %23, %24 : vector<1x128xf32>
      %c0_21 = arith.constant 0 : index
      %c0_22 = arith.constant 0 : index
      %c0_23 = arith.constant 0 : index
      %26 = vector.load %arg7[%c0_21, %c0_22, %c0_23] : memref<1x1x128xf32, #tpu.memory_space<vmem>>, vector<1x1x128xf32>
      %27 = vector.shape_cast %26 : vector<1x1x128xf32> to vector<1x128xf32>
      %28 = vector.shape_cast %25 : vector<1x128xf32> to vector<1x1x128xf32>
      tpu.vector_store %arg7[%c0_21, %c0_22, %c0_23], %28 {strides = array<i32>} : memref<1x1x128xf32, #tpu.memory_space<vmem>>, vector<1x1x128xf32>,
    } else {
    }
    return
  }
  func.func @transform_0(%arg0: i32, %arg1: i32) -> (i32, i32, i32) {
    %c0_i32 = arith.constant 0 : i32
    %c0_i32_0 = arith.constant 0 : i32
    return %arg0, %arg1, %c0_i32 : i32, i32, i32
  }
  func.func @transform_1(%arg0: i32, %arg1: i32) -> (i32, i32) {
    %c0_i32 = arith.constant 0 : i32
    %c0_i32_0 = arith.constant 0 : i32
    %c0_i32_1 = arith.constant 0 : i32
    return %c0_i32, %c0_i32_0 : i32, i32
  }
  func.func @transform_2(%arg0: i32, %arg1: i32) -> (i32, i32) {
    %c0_i32 = arith.constant 0 : i32
    %c0_i32_0 = arith.constant 0 : i32
    %c0_i32_1 = arith.constant 0 : i32
    return %c0_i32, %c0_i32_0 : i32, i32
  }
  func.func @transform_3(%arg0: i32, %arg1: i32) -> (i32, i32) {
    %c0_i32 = arith.constant 0 : i32
    %c0_i32_0 = arith.constant 0 : i32
    %c0_i32_1 = arith.constant 0 : i32
    return %c0_i32, %c0_i32_0 : i32, i32
  }
  func.func @transform_4(%arg0: i32, %arg1: i32) -> (i32, i32) {
    %c0_i32 = arith.constant 0 : i32
    %c0_i32_0 = arith.constant 0 : i32
    %c0_i32_1 = arith.constant 0 : i32
    return %c0_i32, %c0_i32_0 : i32, i32
  }
  func.func @transform_5(%arg0: i32, %arg1: i32) -> (i32, i32, i32) {
    %c0_i32 = arith.constant 0 : i32
    %c0_i32_0 = arith.constant 0 : i32
    %c0_i32_1 = arith.constant 0 : i32
    return %arg0, %c0_i32, %c0_i32_0 : i32, i32, i32
  }
}

</mosaic_0001>

<bundles_post_ra>
// kernel: base_head_net.1
= control target key start
LH: loop header
LB: loop body
LE: loop exit
PB: predicated region body
PF: predicated region fallthrough
CT: control target
= control target key end

     0   :  { %10 = vsyncpa [#allocation4], 0  ;;  %s1230_s0 = inlined_call_operand.vmem [shape: bf16[2,256,36], index: 0, kind: input, shape index: {}]   ;;  %s1231_s1 = inlined_call_operand.vmem [shape: bf16[36,128], index: 1, kind: input, shape index: {}]   ;;  %s1232_s2 = inlined_call_operand.vmem [shape: f32[1,128], index: 2, kind: input, shape index: {}]   ;;  %s1233_s3 = inlined_call_operand.vmem [shape: bf16[128,128], index: 3, kind: input, shape index: {}]   ;;  %s1234_s4 = inlined_call_operand.vmem [shape: f32[1,128], index: 4, kind: input, shape index: {}]   ;;  %s1235_s5 = inlined_call_operand.hbm [shape: f32[2,1,128], index: 5, kind: output, shape index: {}]  }
   0x1   :  { %12 = vsyncpa [#allocation4 + $0x1], 0  ;;  %s1036_s18 = smov 0   ;;  %s1038_s19 = smov 0  }
   0x2   :  { %s1040_s20 = smov 0   ;;  %s1042_s21 = smov 0  }
   0x3   :  { %s1044_s22 = smov 0   ;;  %s1046_s23 = smov 0  }
   0x4   :  { %s1048_s24 = smov 0   ;;  %s1050_s25 = smov 0  }
   0x5 LB: > { %s702_s26 = sadd.s32 4294967295, %s1000_s25   ;;  %s703_s27 = sadd.s32 4294967294, %s1000_s25   ;;  %s1000_s25 = sphi %s1050_s25, %s18_s25   ;;  %s996_s24 = sphi %s1048_s24, %s1244_s24   ;;  %s992_s23 = sphi %s1046_s23, %s1243_s23   ;;  %s988_s22 = sphi %s1044_s22, %s1242_s22   ;;  %s984_s21 = sphi %s1042_s21, %s1241_s21   ;;  %s980_s20 = sphi %s1040_s20, %s1240_s20   ;;  %s976_s19 = sphi %s1038_s19, %s1239_s19   ;;  %s972_s18 = sphi %s1036_s18, %s1238_s18  }
   0x6   : > { %s27_s28 = sadd.s32 1, %s992_s23  ;;  %s30_s29 = sadd.s32 1, %s996_s24 }
   0x7   : > { %p28_p0 = scmp.ge.s32.totalorder %s27_s28, 2  ;;  %p159_p1 = scmp.ne.s32.totalorder %s980_s20, %s976_s19 }
   0x8   : > { %p160_p2 = scmp.eq.s32.totalorder %s702_s26, 3  ;;  %p165_p4 = scmp.ne.s32.totalorder %s976_s19, %s972_s18 }
   0x9   : > { %s1246_s28 = smov (%p28_p0, %s27_s28), 0  ;;  %s1248_s29 = smov (!%p28_p0, %s30_s29), %s996_s24 }
   0xa   : > { %p1085_p3 = por %p160_p2, %p159_p1  ;;  %p32_p5 = scmp.ge.s32.totalorder %s1248_s29, 2 }
   0xb   : > { %p166_p6 = scmp.eq.s32.totalorder %s703_s27, 3  ;;  %p706_p7 = scmp.ge.s32.totalorder %s1000_s25, 1 }
   0xc   : > { %p209_p8 = scmp.lt.s32.totalorder %s1000_s25, 5  ;;  %s1250_s29 = smov (%p32_p5, %s1248_s29), 0 }
   0xd   : > { %p1095_p9 = por %p166_p6, %p165_p4  ;;  %s146_s7 = ssub.s32 %s996_s24, %s1250_s29 }
   0xe   : > { %p210_p10 = pnand %p706_p7, %p209_p8  ;;  %s149_s8 = sadd.s32 1, %s980_s20 }
   0xf   : > { %p147_p11 = scmp.eq.s32.totalorder %s146_s7, 0  ;;  %s238_s10 = sand.u32 (!%p210_p10), 1, %s976_s19  }
  0x10   : > { %213 = sbr.rel (%p210_p10) target bundleno = 556 (0x22c), region = 40  ;;  %s707_s11 = sshll.u32 (!%p210_p10), %s984_s21, 4 }
  0x11   : > { %s1103_s9 = scalar_select %p147_p11, %s980_s20, %s149_s8  }
  0x12   : > { %p241_p12 = scmp.lt.s32.totalorder (!%p210_p10), %s988_s22, 1  ;;  %p243_p13 = scmp.lt.s32.totalorder (!%p210_p10), %s707_s11, 31 }
  0x13   : > { %s1116_s27 = scalar_lea.vmem (!%p210_p10), [#allocation3], %s238_s10  ;;  %p710_p0 = scmp.ne.s32.totalorder (!%p210_p10), %s984_s21, 0 }
  0x17   : > { %s242_s12 = scalar_select %p241_p12, %s988_s22, 1 }
  0x18   : > { %s1252_s11 = smov (!%p243_p13, %s707_s11), 31  ;;  %254 = sbr.rel (%p710_p0) target bundleno = 31 (0x1f), region = 44 }
  0x19   : > { %s708_s13 = sshll.u32 %s242_s12, 5  ;;  %v1002_v0 = vmov (!%p710_p0), 0.0  }
  0x1a   : > { %s246_s14 = sadd.s32 %s708_s13, %s1252_s11  ;;  %255 = vst [vmem:[#allocation2] sm:$0x1] (!%p710_p0), %v1002_v0 }
  0x1b   : > { %s709_s15 = sshll.u32 %s246_s14, 2 }
  0x1c   : > { %s1112_s26 = scalar_lea.vmem %s1230_s0, %s709_s15 }
  0x1f PF: > { %v887_v1 = vld [vmem:[%s1231_s1] sm:$0xff]   ;;  %v888_v2 = vld [vmem:[%s1231_s1 + $0x8] sm:$0xff]   ;;  %vm339_vm0 = vcmask 293888   ;;  %v889_v3 = vld [vmem:[%s1231_s1 + $0x10] ss:$0 sps:$4 sm:$0x33]  }
  0x20   : > { %763 = vmatprep.subr.bf16.mxu0 %v887_v1  ;;  %v890_v4 = vld [vmem:[%s1112_s26] sm:$0xff]   ;;  %805 = vmatprep.subr.bf16.mxu1 %v887_v1  ;;  %vm364_vm1 = vcmask 1041408   ;;  %v891_v7 = vld [vmem:[%s1112_s26 + $0x8] sm:$0xff]   ;;  %v892_v9 = vld [vmem:[%s1112_s26 + $0x10] sm:$0xff]   ;;  %p731_p1 = scmp.ne.s32.totalorder %s984_s21, 1 }
  0x21   : > { %764 = vmatpush3.bf16.msra.mxu0 %v887_v1  ;;  %808 = vmatpush3.bf16.msra.mxu1 %v887_v1  ;;  %v894_v5 = vld [vmem:[%s1112_s26 + $0x20] sm:$0xff]   ;;  %v366_v6 = vsel %vm364_vm1, %v889_v3, 0  ;;  %v895_v8 = vld [vmem:[%s1112_s26 + $0x28] sm:$0xff]   ;;  %v896_v10 = vld [vmem:[%s1112_s26 + $0x30] sm:$0xff]   ;;  %vm1004_vm2 = vmmov (!%p731_p1), 0  }
  0x22   : > { %765 = vmatprep.subr.bf16.mxu0 %v888_v2  ;;  %769 = vmatprep.mubr.msk.bf16.mxu0 %vm339_vm0, %v890_v4  ;;  %v893_v11 = vld [vmem:[%s1112_s26 + $0x18] sm:$0xff]   ;;  %v711_v13 = vld [vmem:[%s1232_s2] ss:$0 sm:$0xff] }
  0x23   : > { %806 = vmatprep.subr.bf16.mxu1 %v888_v2  ;;  %777 = vmatprep.mubr.msk.bf16.mxu1 %vm339_vm0, %v894_v5  ;;  %v897_v12 = vld [vmem:[%s1112_s26 + $0x38] sm:$0xff]  }
  0x25   : > { %766 = vmatpush3.bf16.msra.mxu0 %v888_v2  ;;  %809 = vmatpush3.bf16.msra.mxu1 %v888_v2 }
  0x26   : > { %811 = vmatprep.subr.msk.bf16.mxu0 %vm364_vm1, %v889_v3  ;;  %812 = vmatprep.subr.msk.bf16.mxu1 %vm364_vm1, %v889_v3 }
  0x29   : > { %768 = vmatpush3.bf16.msra.mxu0 %v366_v6  ;;  %810 = vmatpush3.bf16.msra.mxu1 %v366_v6 }
  0x2c   : > { %770 = vmatmul.mubr.msk.bf16.vlgmr.msra.gmra.mrb[0].mxu0 %vm339_vm0, %v891_v7  ;;  %778 = vmatmul.mubr.msk.bf16.vlgmr.msra.gmra.mrb[0].mxu1 %vm339_vm0, %v895_v8 }
  0x2d   : > { %773 = vmatprep.mubr.msk.bf16.mxu0 %vm339_vm0, %v892_v9  ;;  %781 = vmatprep.mubr.msk.bf16.mxu1 %vm339_vm0, %v896_v10 }
  0x34   : > { %774 = vmatmul.mubr.msk.bf16.gmra.mrb[4].mxu0 %vm339_vm0, %v893_v11  ;;  %782 = vmatmul.mubr.msk.bf16.gmra.mrb[4].mxu1 %vm339_vm0, %v897_v12 }
  0xff   : > { %v771_v14 = vpop.f32.mrb[0].mxu0  ;;  %v779_v15 = vpop.f32.mrb[0].mxu1 }
 0x100   : > { %v402_v16 = vpop.f32.mrb[1].mxu0  ;;  %v434_v17 = vpop.f32.mrb[1].mxu1  ;;  %v411_v23 = vadd.f32 %v771_v14, %v711_v13  ;;  %v443_v55 = vadd.f32 %v779_v15, %v711_v13 }
 0x101   : > { %v403_v18 = vadd.f32 %v711_v13, %v402_v16  ;;  %v772_v19 = vpop.f32.mrb[2].mxu0  ;;  %v780_v20 = vpop.f32.mrb[2].mxu1  ;;  %v435_v48 = vadd.f32 %v711_v13, %v434_v17 }
 0x102   : > { %v405_v21 = vpop.f32.mrb[3].mxu0  ;;  %v437_v22 = vpop.f32.mrb[3].mxu1  ;;  %v414_v26 = vadd.f32 %v772_v19, %v711_v13  ;;  %v467_v28 = vmax.f32 %v411_v23, 0.0  ;;  %v446_v58 = vadd.f32 %v780_v20, %v711_v13  ;;  %v475_v61 = vmax.f32 %v443_v55, 0.0  ;;  %v481_v19 = vld [vmem:[#allocation2] sm:$0x1] }
 0x103   : > { %v406_v24 = vadd.f32 %v711_v13, %v405_v21  ;;  %v465_v25 = vmax.f32 %v403_v18, 0.0  ;;  %v473_v53 = vmax.f32 %v435_v48, 0.0  ;;  %v438_v54 = vadd.f32 %v711_v13, %v437_v22  ;;  %v899_v23 = vld [vmem:[%s1233_s3 + $0x8] sm:$0xff] (!%p731_p1)  }
 0x104   : > { %v468_v34 = vmax.f32 %v414_v26, 0.0  ;;  %v476_v63 = vmax.f32 %v446_v58, 0.0  ;;  %v1003_v22 = vmov (!%p731_p1), 0.0   ;;  %v902_v26 = vld [vmem:[%s1233_s3 + $0x20] sm:$0xff] (!%p731_p1)  }
 0x105   : > { %v466_v27 = vmax.f32 %v406_v24, 0.0  ;;  %v474_v59 = vmax.f32 %v438_v54, 0.0  ;;  %785 = vmatprep.subr.bf16.mxu0 (!%p731_p1), %v1003_v22  ;;  %801 = vmatprep.mubr.msk.bf16.mxu0 (!%p731_p1), %vm1004_vm2, %v1003_v22  ;;  %v900_v24 = vld [vmem:[%s1233_s3 + $0x10] sm:$0xff] (!%p731_p1)  }
 0x107   : > { %v482_v29 = vadd.f32 %v466_v27, %v465_v25  ;;  %v775_v30 = vpop.f32.mrb[4].mxu0  ;;  %v783_v31 = vpop.f32.mrb[4].mxu1  ;;  %v901_v25 = vld [vmem:[%s1233_s3 + $0x18] sm:$0xff] (!%p731_p1)   ;;  %v903_v27 = vld [vmem:[%s1233_s3 + $0x28] sm:$0xff] (!%p731_p1)  }
 0x108   : > { %v418_v32 = vpop.f32.mrb[5].mxu0  ;;  %v450_v33 = vpop.f32.mrb[5].mxu1  ;;  %v427_v41 = vadd.f32 %v775_v30, %v711_v13  ;;  %v459_v3 = vadd.f32 %v783_v31, %v711_v13 }
 0x109   : > { %v483_v35 = vadd.f32 %v482_v29, %v467_v28  ;;  %v419_v36 = vadd.f32 %v711_v13, %v418_v32  ;;  %v776_v37 = vpop.f32.mrb[6].mxu0  ;;  %v784_v38 = vpop.f32.mrb[6].mxu1  ;;  %v451_v60 = vadd.f32 %v711_v13, %v450_v33  ;;  %v904_v28 = vld [vmem:[%s1233_s3 + $0x30] sm:$0xff] (!%p731_p1)   ;;  %v905_v29 = vld [vmem:[%s1233_s3 + $0x38] sm:$0xff] (!%p731_p1)   ;;  %v527_v32 = vld [vmem:[%s1234_s4] sm:$0x1] (!%p731_p1) }
 0x10a   : > { %v421_v39 = vpop.f32.mrb[7].mxu0  ;;  %v453_v40 = vpop.f32.mrb[7].mxu1  ;;  %v430_v46 = vadd.f32 %v776_v37, %v711_v13  ;;  %v471_v49 = vmax.f32 %v427_v41, 0.0  ;;  %v462_v6 = vadd.f32 %v784_v38, %v711_v13  ;;  %v479_v8 = vmax.f32 %v459_v3, 0.0 }
 0x10b   : > { %v469_v42 = vmax.f32 %v419_v36, 0.0  ;;  %v484_v43 = vadd.f32 %v483_v35, %v468_v34  ;;  %v422_v44 = vadd.f32 %v711_v13, %v421_v39  ;;  %v477_v1 = vmax.f32 %v451_v60, 0.0 }
 0x10c   : > { %v472_v51 = vmax.f32 %v430_v46, 0.0  ;;  %v454_v2 = vadd.f32 %v711_v13, %v453_v40  ;;  %v480_v10 = vmax.f32 %v462_v6, 0.0  ;;  %v898_v13 = vld [vmem:[%s1233_s3] sm:$0xff] (!%p731_p1)  }
 0x10d   : > { %v485_v45 = vadd.f32 %v484_v43, %v469_v42  ;;  %v470_v47 = vmax.f32 %v422_v44, 0.0  ;;  %786 = vmatpush3.bf16.msra.mxu0 (!%p731_p1), %v898_v13 }
 0x10e   : > { %v478_v7 = vmax.f32 %v454_v2, 0.0  ;;  %787 = vmatprep.subr.bf16.mxu0 (!%p731_p1), %v1003_v22 }
 0x10f   : > { %v486_v50 = vadd.f32 %v485_v45, %v470_v47 }
 0x111   : > { %v487_v52 = vadd.f32 %v486_v50, %v471_v49  ;;  %788 = vmatpush3.bf16.msra.mxu0 (!%p731_p1), %v899_v23 }
 0x112   : > { %789 = vmatprep.subr.bf16.mxu0 (!%p731_p1), %v1003_v22 }
 0x113   : > { %v488_v56 = vadd.f32 %v487_v52, %v472_v51 }
 0x115   : > { %v489_v57 = vadd.f32 %v488_v56, %v473_v53  ;;  %790 = vmatpush3.bf16.msra.mxu0 (!%p731_p1), %v900_v24 }
 0x116   : > { %791 = vmatprep.subr.bf16.mxu0 (!%p731_p1), %v1003_v22 }
 0x117   : > { %v490_v62 = vadd.f32 %v489_v57, %v474_v59 }
 0x119   : > { %v491_v0 = vadd.f32 %v490_v62, %v475_v61  ;;  %792 = vmatpush3.bf16.msra.mxu0 (!%p731_p1), %v901_v25 }
 0x11a   : > { %793 = vmatprep.subr.bf16.mxu0 (!%p731_p1), %v1003_v22 }
 0x11b   : > { %v492_v4 = vadd.f32 %v491_v0, %v476_v63 }
 0x11d   : > { %v493_v5 = vadd.f32 %v492_v4, %v477_v1  ;;  %794 = vmatpush3.bf16.msra.mxu0 (!%p731_p1), %v902_v26 }
 0x11e   : > { %795 = vmatprep.subr.bf16.mxu0 (!%p731_p1), %v1003_v22 }
 0x11f   : > { %v494_v9 = vadd.f32 %v493_v5, %v478_v7 }
 0x121   : > { %v495_v11 = vadd.f32 %v494_v9, %v479_v8  ;;  %796 = vmatpush3.bf16.msra.mxu0 (!%p731_p1), %v903_v27 }
 0x122   : > { %797 = vmatprep.subr.bf16.mxu0 (!%p731_p1), %v1003_v22 }
 0x123   : > { %v496_v12 = vadd.f32 %v495_v11, %v480_v10 }
 0x125   : > { %v497_v14 = vrot.slane %v496_v12, 4  ;;  %798 = vmatpush3.bf16.msra.mxu0 (!%p731_p1), %v904_v28 }
 0x126   : > { %799 = vmatprep.subr.bf16.mxu0 (!%p731_p1), %v1003_v22 }
 0x127   : > { %v498_v15 = vadd.f32 %v497_v14, %v496_v12 }
 0x129   : > { %v499_v16 = vrot.slane %v498_v15, 2  ;;  %800 = vmatpush3.bf16.msra.mxu0 (!%p731_p1), %v905_v29 }
 0x12b   : > { %v500_v17 = vadd.f32 %v499_v16, %v498_v15 }
 0x12d   : > { %v501_v18 = vrot.slane %v500_v17, 1  ;;  %508 = sbr.rel (%p731_p1) target bundleno = 532 (0x214), region = 48 }
 0x12f   : > { %v502_v20 = vadd.f32 %v501_v18, %v500_v17 }
 0x131   : > { %v503_v21 = vadd.f32 %v502_v20, %v481_v19 }
 0x133   : > { %504 = vst [vmem:[#allocation2] sm:$0x1] %v503_v21 }
 0x13a   : > { %v509_v30 = vld [vmem:[#allocation2] sm:$0x1] }
 0x13b   : > { %v510_v31 = vpack.c.bf16 %v509_v30, %v509_v30 }
 0x13d   : > { %802 = vmatmul.mubr.bf16.vlgmr.msra.gmra.mrb[0].mxu0 %v510_v31 }
 0x210   : > { %v610_v33 = vpop.f32.mrb[0].mxu0 }
 0x211   : > { %v611_v34 = vadd.f32 %v610_v33, %v527_v32  ;;  %v803_v35 = vpop.f32.mrb[1].mxu0 }
 0x212   : > { %v613_v36 = vpop.f32.mrb[2].mxu0 }
 0x213   : > { %616 = vst [vmem:[%s1116_s27] sm:$0x1] %v611_v34  ;;  %v804_v37 = vpop.f32.mrb[3].mxu0 }
 0x214 PF: > { %s740_s13 = sshll.u32 %s988_s22, 4  ;;  %s630_s17 = sshll.u32 %s1116_s27, 4  ;;  %s631_s17 = int_to_ptr.vmem [resolvable:$true] %s630_s17 }
 0x215   : > { %s1180_s16 = scalar_lea.hbm %s1235_s5, %s740_s13  ;;  %s618_s26 = scalar_lea.sflag [#allocation4], %s238_s10 }
 0x216   : > { %s906_s7 = scalar_lea.vmem %s631_s17, 16  ;;  %s1005_s8 = smov [#allocation3]  }
 0x217   : > { %p907_p2 = scmp.ne.s32.totalorder %s631_s17, %s906_s7  ;;  %s910_s11 = sshll.u32 %s1005_s8, 4  ;;  %s911_s11 = int_to_ptr.vmem [resolvable:$false] %s910_s11 }
 0x218   : > { %s912_s12 = scalar_lea.vmem %s911_s11, 32  ;;  %p913_p6 = scmp.lt.s32.totalorder %s631_s17, %s911_s11 }
 0x219   : > { %p908_p4 = pnand %p907_p2, %p1085_p3  ;;  %p914_p7 = scmp.lt.s32.totalorder %s912_s12, %s906_s7 }
 0x21b   : > { %p909_p5 = pneg %p908_p4  ;;  %p915_p8 = por %p914_p7, %p913_p6 }
 0x21d   : > { %p916_p10 = pnand %p915_p8, %p909_p5 }
 0x21f   : > { %919 = shalt.err (!%p916_p10)
}
 0x220   : > { %s920_s22 = scalar_lea.hbm %s1180_s16, 16  ;;  %s924_s21 = scalar_lea.hbm %s1235_s5, 32 }
 0x221   : > { %p921_p11 = scmp.ne.s32.totalorder %s1180_s16, %s920_s22  ;;  %p925_p0 = scmp.lt.u32.totalorder %s1180_s16, %s1235_s5 }
 0x222   : > { %p926_p1 = scmp.lt.u32.totalorder %s924_s21, %s920_s22  ;;  %p928_p4 = scmp.lt.u32.totalorder %s920_s22, %s1180_s16 }
 0x223   : > { %p922_p12 = pnand %p921_p11, %p1085_p3 }
 0x224   : > { %p927_p2 = por %p926_p1, %p925_p0 }
 0x225   : > { %p923_p13 = pneg %p922_p12 }
 0x226   : > { %p929_p5 = por %p928_p4, %p927_p2 }
 0x228   : > { %p930_p6 = pnand %p929_p5, %p923_p13 }
 0x22a   : > { %933 = shalt.err (!%p930_p6)
}
 0x22b   : > { %813 = dma.vmem_to_hbm [thread:$0]  (%p1085_p3), %s631_s17, 16, %s1180_s16, %s618_s26  }
 0x22c PF: > { %p819_p7 = scmp.ge.s32.totalorder %s1000_s25, 2  ;;  %s642_s15 = sand.u32 1, %s972_s18  }
 0x22d   : > { %s643_s7 = scalar_lea.sflag [#allocation4], %s642_s15 }
 0x22e   : > { %p816_p8 = pnand %p819_p7, %p1095_p9 }
 0x230   : > { %967 = dma.done.wait (!%p816_p8), %s643_s7, 16  }
 0x231   : > { %969 = vsyncadd (!%p816_p8), %s643_s7, 4294967280  ;;  %s18_s25 = sadd.s32 1, %s1000_s25   ;;  %s1238_s18 = smov %s976_s19 }
 0x232   : > { %p15_p10 = scmp.ge.s32.totalorder %s18_s25, 6   ;;  %s1239_s19 = smov %s980_s20 }
 0x233   : > { %s1240_s20 = smov %s1103_s9  ;;  %s1241_s21 = smov %s992_s23 }
 0x234   : > { %s1242_s22 = smov %s996_s24  ;;  %s1243_s23 = smov %s1246_s28 }
 0x235   : > { %s1244_s24 = smov %s1250_s29  ;;  %17 = sbr.rel (!%p15_p10) target bundleno = 5 (0x5), region = 83 }
 0x23c   :  { %647 = vsyncpa [#allocation4], 1 }
 0x23d   :  { %649 = vsyncpa [#allocation4 + $0x1], 1 }

</bundles_post_ra>
